<compile_context>
chip_gen: v5e
topology: v5e:2x2
jax: 0.10.0
libtpu: 0.0.40
codegen_flags: <defaults>
</compile_context>

<pallas_src>
import jax
import jax.numpy as jnp
from jax.experimental import pallas as pl
from jax.experimental.pallas import tpu as pltpu


def _round_up(n, m):
    return ((n + m - 1) // m) * m


def _autoencoder_kernel(x_ref, w1_ref, b1_ref, w2_ref, b2_ref, o_ref):
    # encoder: Linear(D -> E) + ReLU.  MXU matmul, f32 accumulate; VPU ReLU.
    h = jnp.dot(x_ref[...], w1_ref[...], preferred_element_type=jnp.float32)
    h = jnp.maximum(h + b1_ref[...], 0.0)            # (TB, Ep) + (1, Ep), f32
    # decoder: Linear(E -> D) + Sigmoid.  Cast h to the streamed weight dtype
    # only at the MXU input; keep elementwise math in f32 (sigmoid -> EUP).
    y = jnp.dot(h.astype(w2_ref.dtype), w2_ref[...],
                preferred_element_type=jnp.float32)
    y = y + b2_ref[...]                               # (TB, Dp) + (1, Dp), f32
    o_ref[...] = jax.nn.sigmoid(y).astype(o_ref.dtype)


def autoencoder_forward(x, w1, b1, w2, b2, *, block_batch=2048, out_dtype=None):
    """x: (B, D); w1: (D, E); b1: (1, E) or (E,); w2: (E, D); b2: (1, D) or (D,)."""
    B, D = x.shape
    E = w1.shape[1]
    assert w1.shape == (D, E) and w2.shape == (E, D)
    b1 = jnp.reshape(b1, (1, E))
    b2 = jnp.reshape(b2, (1, D))
    out_dtype = x.dtype if out_dtype is None else jnp.dtype(out_dtype)

    # ---- one-time parameter prep (tiny arrays, VMEM-resident in the kernel) ----
    # Stream weights in the same dtype as x (bf16 x -> bf16 weights on the MXU);
    # keep biases in f32 so the elementwise path stays f32 on all generations.
    w1 = w1.astype(x.dtype)
    w2 = w2.astype(x.dtype)
    b1 = b1.astype(jnp.float32)
    b2 = b2.astype(jnp.float32)

    # Zero-pad the encoding dim to a lane multiple so h is lane-dense.
    # Padded columns see relu(0 + 0) = 0 and contribute nothing to the decoder.
    Ep = _round_up(E, 128)
    if Ep != E:
        w1 = jnp.pad(w1, ((0, 0), (0, Ep - E)))
        b1 = jnp.pad(b1, ((0, 0), (0, Ep - E)))
        w2 = jnp.pad(w2, ((0, Ep - E), (0, 0)))

    # Pad the feature dim to a lane multiple so output stores are unmasked
    # full-lane vst.  (No-op for D=128; for e.g. D=784 this costs one extra
    # pass over x / out but removes masked stores on every tile.)
    Dp = _round_up(D, 128)
    x_in = x
    if Dp != D:
        w1 = jnp.pad(w1, ((0, Dp - D), (0, 0)))
        w2 = jnp.pad(w2, ((0, 0), (0, Dp - D)))
        b2 = jnp.pad(b2, ((0, 0), (0, Dp - D)))
        x_in = jnp.pad(x, ((0, 0), (0, Dp - D)))

    # ---- batch tiling: biggest tile that fits, but keep >= 2 grid steps ----
    tb = min(block_batch, _round_up(B, 8))
    if B > 8 and tb >= B:
        # Split into at least 2 grid steps: lets the pipeline overlap DMA with
        # compute and lets v7x's two TensorCores each take tiles.
        tb = max(8, _round_up(-(-B // 2), 8))
    n_blocks = pl.cdiv(B, tb)
    # Ragged batches are handled by Pallas partial edge blocks: no jnp.pad on x
    # and no out[:B] slice (no extra HBM round-trips).

    xsz = jnp.dtype(x.dtype).itemsize
    osz = jnp.dtype(out_dtype).itemsize
    cost = pl.CostEstimate(
        flops=4 * B * Dp * Ep,                         # two (B, Dp, Ep) matmuls
        transcendentals=B * Dp,                        # sigmoid
        bytes_accessed=B * Dp * (xsz + osz) + 2 * Dp * Ep * xsz + (Ep + Dp) * 4,
    )

    # Estimated VMEM working set: double-buffered x/out tiles + resident params.
    vmem_est = (2 * tb * Dp * (xsz + osz)
                + 2 * Dp * Ep * xsz + (Ep + Dp) * 4)
    cp_kwargs = dict(dimension_semantics=("parallel",))
    if vmem_est > 12 * 1024 * 1024:
        # Beyond v5e's 16 MiB scoped-VMEM default: raise the limit explicitly.
        cp_kwargs["vmem_limit_bytes"] = min(int(vmem_est * 3 // 2), 48 * 1024 * 1024)

    out = pl.pallas_call(
        _autoencoder_kernel,
        out_shape=jax.ShapeDtypeStruct((B, Dp), out_dtype),
        grid_spec=pltpu.PrefetchScalarGridSpec(
            num_scalar_prefetch=0,
            grid=(n_blocks,),
            in_specs=[
                pl.BlockSpec((tb, Dp), lambda i: (i, 0)),    # x tile (pipelined)
                pl.BlockSpec((Dp, Ep), lambda i: (0, 0)),    # w1: VMEM-resident
                pl.BlockSpec((1, Ep), lambda i: (0, 0)),     # b1: VMEM-resident
                pl.BlockSpec((Ep, Dp), lambda i: (0, 0)),    # w2: VMEM-resident
                pl.BlockSpec((1, Dp), lambda i: (0, 0)),     # b2: VMEM-resident
            ],
            out_specs=pl.BlockSpec((tb, Dp), lambda i: (i, 0)),
        ),
        compiler_params=pltpu.CompilerParams(**cp_kwargs),
        cost_estimate=cost,
    )(x_in, w1, b1, w2, b2)

    return out if Dp == D else out[:, :D]


def reference_forward(x, w1, b1, w2, b2):
    h = jnp.maximum(x @ w1 + b1, 0.0)
    return jax.nn.sigmoid(h @ w2 + b2)


if __name__ == "__main__":
    # Shapes consistent with the module: input_dim=128, encoding_dim=32.
    input_dim, encoding_dim = 128, 32

    key = jax.random.PRNGKey(0)
    kx1, kx2, kx3, kw1, kb1, kw2, kb2 = jax.random.split(key, 7)

    # Deterministic synthetic parameters (PyTorch Linear weight is (out, in);
    # we store the transpose (in, out) so the kernel does x @ W).
    bound1 = float(input_dim) ** -0.5
    bound2 = float(encoding_dim) ** -0.5
    w1 = jax.random.uniform(kw1, (input_dim, encoding_dim), jnp.float32, -bound1, bound1)
    b1 = jax.random.uniform(kb1, (1, encoding_dim), jnp.float32, -bound1, bound1)
    w2 = jax.random.uniform(kw2, (encoding_dim, input_dim), jnp.float32, -bound2, bound2)
    b2 = jax.random.uniform(kb2, (1, input_dim), jnp.float32, -bound2, bound2)

    # Case 1: tiny f32 batch (single grid step) -- exact vs. reference.
    x1 = jax.random.normal(kx1, (8, input_dim), dtype=jnp.float32)
    out1 = autoencoder_forward(x1, w1, b1, w2, b2)
    jax.block_until_ready(out1)
    ref1 = reference_forward(x1, w1, b1, w2, b2)
    assert out1.shape == x1.shape
    assert jnp.allclose(out1, ref1, atol=1e-5, rtol=1e-5), "mismatch (case 1, f32)"

    # Case 2: bf16 streaming, ragged multi-block grid (no pad/slice round-trips).
    x2_f32 = jax.random.normal(kx2, (40, input_dim), dtype=jnp.float32)
    x2 = x2_f32.astype(jnp.bfloat16)
    out2 = autoencoder_forward(x2, w1, b1, w2, b2, block_batch=16,
                               out_dtype=jnp.float32)
    jax.block_until_ready(out2)
    ref2 = reference_forward(x2.astype(jnp.float32), w1, b1, w2, b2)
    assert out2.shape == (40, input_dim)
    assert float(jnp.max(jnp.abs(out2 - ref2))) < 2e-2, "mismatch (case 2, bf16)"

    # Case 3: default large tile with a batch smaller than one tile
    # (exercises the >=2-block split + partial edge block), f32 exact.
    x3 = jax.random.normal(kx3, (300, input_dim), dtype=jnp.float32)
    out3 = autoencoder_forward(x3, w1, b1, w2, b2)
    jax.block_until_ready(out3)
    ref3 = reference_forward(x3, w1, b1, w2, b2)
    assert out3.shape == x3.shape
    assert jnp.allclose(out3, ref3, atol=1e-5, rtol=1e-5), "mismatch (case 3, f32)"

    print("KERNEL_OK")
</pallas_src>

<mosaic_0001>
module attributes {stable_mosaic.version = 11 : i64} {
  func.func @_autoencoder_kernel(%arg0: i32, %arg1: memref<8x128xf32, #tpu.memory_space<vmem>>, %arg2: memref<128x128xf32, #tpu.memory_space<vmem>>, %arg3: memref<1x128xf32, #tpu.memory_space<vmem>>, %arg4: memref<128x128xf32, #tpu.memory_space<vmem>>, %arg5: memref<1x128xf32, #tpu.memory_space<vmem>>, %arg6: memref<8x128xf32, #tpu.memory_space<vmem>>) attributes {dimension_semantics = [#tpu.dimension_semantics<parallel>], iteration_bounds = array<i64: 1>, scalar_prefetch = 0 : i64, scratch_operands = 0 : i64, tpu.core_type = #tpu.core_type<tc>, window_params = [{transform_indices = @transform_0, window_bounds = array<i64: 8, 128>}, {pipeline_mode = #tpu.pipeline_mode<synchronous>, transform_indices = @transform_1, window_bounds = array<i64: 128, 128>}, {pipeline_mode = #tpu.pipeline_mode<synchronous>, transform_indices = @transform_2, window_bounds = array<i64: 1, 128>}, {pipeline_mode = #tpu.pipeline_mode<synchronous>, transform_indices = @transform_3, window_bounds = array<i64: 128, 128>}, {pipeline_mode = #tpu.pipeline_mode<synchronous>, transform_indices = @transform_4, window_bounds = array<i64: 1, 128>}, {transform_indices = @transform_5, window_bounds = array<i64: 8, 128>}]} {
    %c0 = arith.constant 0 : index
    %c0_0 = arith.constant 0 : index
    %0 = vector.load %arg1[%c0, %c0_0] : memref<8x128xf32, #tpu.memory_space<vmem>>, vector<8x128xf32>
    %c0_1 = arith.constant 0 : index
    %c0_2 = arith.constant 0 : index
    %1 = vector.load %arg2[%c0_1, %c0_2] : memref<128x128xf32, #tpu.memory_space<vmem>>, vector<128x128xf32>
    %cst = arith.constant dense<0.000000e+00> : vector<8x128xf32>
    %2 = tpu.matmul %0, %1, %cst {dimension_numbers = #tpu.dot_dimension_numbers<[1], [0], [0], [1], [0, 0, 1, 1], [], []>} : vector<8x128xf32>, vector<128x128xf32>, vector<8x128xf32> -> vector<8x128xf32>
    %c0_3 = arith.constant 0 : index
    %c0_4 = arith.constant 0 : index
    %3 = vector.load %arg3[%c0_3, %c0_4] : memref<1x128xf32, #tpu.memory_space<vmem>>, vector<1x128xf32>
    %4 = vector.broadcast %3 : vector<1x128xf32> to vector<8x128xf32>
    %5 = arith.addf %2, %4 : vector<8x128xf32>
    %cst_5 = arith.constant 0.000000e+00 : f32
    %6 = vector.broadcast %cst_5 : f32 to vector<8x128xf32>
    %7 = arith.maximumf %5, %6 : vector<8x128xf32>
    %c0_6 = arith.constant 0 : index
    %c0_7 = arith.constant 0 : index
    %8 = vector.load %arg4[%c0_6, %c0_7] : memref<128x128xf32, #tpu.memory_space<vmem>>, vector<128x128xf32>
    %cst_8 = arith.constant dense<0.000000e+00> : vector<8x128xf32>
    %9 = tpu.matmul %7, %8, %cst_8 {dimension_numbers = #tpu.dot_dimension_numbers<[1], [0], [0], [1], [0, 0, 1, 1], [], []>} : vector<8x128xf32>, vector<128x128xf32>, vector<8x128xf32> -> vector<8x128xf32>
    %c0_9 = arith.constant 0 : index
    %c0_10 = arith.constant 0 : index
    %10 = vector.load %arg5[%c0_9, %c0_10] : memref<1x128xf32, #tpu.memory_space<vmem>>, vector<1x128xf32>
    %11 = vector.broadcast %10 : vector<1x128xf32> to vector<8x128xf32>
    %12 = arith.addf %9, %11 : vector<8x128xf32>
    %13 = arith.negf %12 : vector<8x128xf32>
    %14 = math.exp %13 : vector<8x128xf32>
    %cst_11 = arith.constant 1.000000e+00 : f32
    %15 = vector.broadcast %cst_11 : f32 to vector<8x128xf32>
    %16 = arith.addf %15, %14 : vector<8x128xf32>
    %17 = arith.divf %15, %16 : vector<8x128xf32>
    %c0_12 = arith.constant 0 : index
    %c0_13 = arith.constant 0 : index
    %18 = vector.load %arg6[%c0_12, %c0_13] : memref<8x128xf32, #tpu.memory_space<vmem>>, vector<8x128xf32>
    tpu.vector_store %arg6[%c0_12, %c0_13], %17 {strides = array<i32>} : memref<8x128xf32, #tpu.memory_space<vmem>>, vector<8x128xf32>,
    return
  }
  func.func @transform_0(%arg0: i32) -> (i32, i32) {
    %c0_i32 = arith.constant 0 : i32
    %c0_i32_0 = arith.constant 0 : i32
    return %arg0, %c0_i32 : i32, i32
  }
  func.func @transform_1(%arg0: i32) -> (i32, i32) {
    %c0_i32 = arith.constant 0 : i32
    %c0_i32_0 = arith.constant 0 : i32
    %c0_i32_1 = arith.constant 0 : i32
    return %c0_i32, %c0_i32_0 : i32, i32
  }
  func.func @transform_2(%arg0: i32) -> (i32, i32) {
    %c0_i32 = arith.constant 0 : i32
    %c0_i32_0 = arith.constant 0 : i32
    %c0_i32_1 = arith.constant 0 : i32
    return %c0_i32, %c0_i32_0 : i32, i32
  }
  func.func @transform_3(%arg0: i32) -> (i32, i32) {
    %c0_i32 = arith.constant 0 : i32
    %c0_i32_0 = arith.constant 0 : i32
    %c0_i32_1 = arith.constant 0 : i32
    return %c0_i32, %c0_i32_0 : i32, i32
  }
  func.func @transform_4(%arg0: i32) -> (i32, i32) {
    %c0_i32 = arith.constant 0 : i32
    %c0_i32_0 = arith.constant 0 : i32
    %c0_i32_1 = arith.constant 0 : i32
    return %c0_i32, %c0_i32_0 : i32, i32
  }
  func.func @transform_5(%arg0: i32) -> (i32, i32) {
    %c0_i32 = arith.constant 0 : i32
    %c0_i32_0 = arith.constant 0 : i32
    return %arg0, %c0_i32 : i32, i32
  }
}

</mosaic_0001>

<bundles_post_ra>
// kernel: tpu_custom_call.1
= control target key start
LH: loop header
LB: loop body
LE: loop exit
PB: predicated region body
PF: predicated region fallthrough
CT: control target
= control target key end

     0   :  { %10 = vsyncpa [#allocation3], 0  ;;  %s355_s0 = inlined_call_operand.hbm [shape: f32[8,128], index: 0, kind: input, shape index: {}]   ;;  %s356_s1 = inlined_call_operand.hbm [shape: f32[128,128], index: 1, kind: input, shape index: {}]   ;;  %s357_s2 = inlined_call_operand.vmem [shape: f32[1,128], index: 2, kind: input, shape index: {}]   ;;  %s358_s3 = inlined_call_operand.hbm [shape: f32[128,128], index: 3, kind: input, shape index: {}]   ;;  %s359_s4 = inlined_call_operand.vmem [shape: f32[1,128], index: 4, kind: input, shape index: {}]   ;;  %s360_s5 = inlined_call_operand.hbm [shape: f32[8,128], index: 5, kind: output, shape index: {}]  }
   0x1   :  { %11 = vsyncpa [#allocation6], 0  ;;  %s28_s20 = sshll.u32 %s356_s1, 4  ;;  %s29_s20 = int_to_ptr.hbm [resolvable:$true] %s28_s20 }
   0x2   :  { %12 = vsyncpa [#allocation4], 0  ;;  %s301_s21 = smov [#allocation5]   ;;  %s18_s25 = sshll.u32 %s355_s0, 4  ;;  %s19_s25 = int_to_ptr.hbm [resolvable:$true] %s18_s25 }
   0x3   :  { %s30_s22 = sshll.u32 %s301_s21, 4  ;;  %s302_s26 = smov 128   ;;  %s31_s22 = int_to_ptr.vmem [resolvable:$true] %s30_s22 }
   0x4   :  { %s303_s27 = smov 8   ;;  %s304_s28 = smov [#allocation2]  }
   0x5   :  { %36 = dma.hbm_to_vmem [thread:$0]  %s29_s20, 2048, %s31_s22, [#allocation6], %s302_s26, %s302_s26, %s303_s27  }
   0x6   :  { %s20_s29 = sshll.u32 %s304_s28, 4  ;;  %s43_s7 = sshll.u32 %s358_s3, 4  ;;  %s21_s29 = int_to_ptr.vmem [resolvable:$true] %s20_s29  ;;  %s44_s7 = int_to_ptr.hbm [resolvable:$true] %s43_s7 }
   0x7   :  { %23 = dma.hbm_to_vmem [thread:$0]  %s19_s25, 128, %s21_s29, [#allocation3]  }
   0x8   :  { %s305_s1 = smov [#allocation7]  }
   0x9   :  { %s45_s8 = sshll.u32 %s305_s1, 4  ;;  %s46_s8 = int_to_ptr.vmem [resolvable:$true] %s45_s8 }
   0xa   :  { %51 = dma.hbm_to_vmem [thread:$0]  %s44_s7, 2048, %s46_s8, [#allocation6], %s302_s26, %s302_s26, %s303_s27  }
   0xb   :  { %295 = dma.done.wait [#allocation3], 128  }
   0xc   :  { %296 = vsyncadd [#allocation3], 4294967168 }
   0xd   :  { %297 = dma.done.wait [#allocation6], 4096  }
   0xe   :  { %298 = vsyncadd [#allocation6], 4294963200  ;;  %v82_v0 = vld [vmem:[#allocation5 + $0x78] sm:$0xff]  ;;  %v81_v1 = vld [vmem:[#allocation5 + $0x70] sm:$0xff] }
   0xf   :  { %87 = vmatpush.msra.mxu0 %v82_v0  ;;  %v80_v2 = vld [vmem:[#allocation5 + $0x68] sm:$0xff]  ;;  %v79_v3 = vld [vmem:[#allocation5 + $0x60] sm:$0xff]  ;;  %v123_v4 = vld [vmem:[#allocation7 + $0x78] sm:$0xff] }
  0x10   :  { %v78_v5 = vld [vmem:[#allocation5 + $0x58] sm:$0xff]  ;;  %128 = vmatpush.msra.mxu1 %v123_v4  ;;  %v122_v6 = vld [vmem:[#allocation7 + $0x70] sm:$0xff]  ;;  %v121_v7 = vld [vmem:[#allocation7 + $0x68] sm:$0xff] }
  0x11   :  { %88 = vmatpush.msra.mxu0 %v81_v1  ;;  %v77_v8 = vld [vmem:[#allocation5 + $0x50] sm:$0xff]  ;;  %v120_v9 = vld [vmem:[#allocation7 + $0x60] sm:$0xff]  ;;  %v76_v10 = vld [vmem:[#allocation5 + $0x48] sm:$0xff] }
  0x12   :  { %129 = vmatpush.msra.mxu1 %v122_v6  ;;  %v119_v11 = vld [vmem:[#allocation7 + $0x58] sm:$0xff]  ;;  %v75_v12 = vld [vmem:[#allocation5 + $0x40] sm:$0xff]  ;;  %v118_v13 = vld [vmem:[#allocation7 + $0x50] sm:$0xff] }
  0x13   :  { %89 = vmatpush.msra.mxu0 %v80_v2  ;;  %v74_v14 = vld [vmem:[#allocation5 + $0x38] sm:$0xff]  ;;  %v117_v15 = vld [vmem:[#allocation7 + $0x48] sm:$0xff]  ;;  %v73_v16 = vld [vmem:[#allocation5 + $0x30] sm:$0xff] }
  0x14   :  { %130 = vmatpush.msra.mxu1 %v121_v7  ;;  %v116_v17 = vld [vmem:[#allocation7 + $0x40] sm:$0xff]  ;;  %v72_v18 = vld [vmem:[#allocation5 + $0x28] sm:$0xff]  ;;  %v115_v19 = vld [vmem:[#allocation7 + $0x38] sm:$0xff] }
  0x15   :  { %90 = vmatpush.msra.mxu0 %v79_v3  ;;  %v71_v20 = vld [vmem:[#allocation5 + $0x20] sm:$0xff]  ;;  %v114_v21 = vld [vmem:[#allocation7 + $0x30] sm:$0xff]  ;;  %v70_v22 = vld [vmem:[#allocation5 + $0x18] sm:$0xff] }
  0x16   :  { %131 = vmatpush.msra.mxu1 %v120_v9  ;;  %v113_v23 = vld [vmem:[#allocation7 + $0x28] sm:$0xff]  ;;  %v69_v24 = vld [vmem:[#allocation5 + $0x10] sm:$0xff]  ;;  %v112_v25 = vld [vmem:[#allocation7 + $0x20] sm:$0xff] }
  0x17   :  { %91 = vmatpush.msra.mxu0 %v78_v5  ;;  %v68_v26 = vld [vmem:[#allocation5 + $0x8] sm:$0xff]  ;;  %v111_v27 = vld [vmem:[#allocation7 + $0x18] sm:$0xff]  ;;  %v67_v28 = vld [vmem:[#allocation5] sm:$0xff] }
  0x18   :  { %132 = vmatpush.msra.mxu1 %v119_v11  ;;  %v66_v29 = vld [vmem:[#allocation2] sm:$0xff]  ;;  %v110_v30 = vld [vmem:[#allocation7 + $0x10] sm:$0xff]  ;;  %v109_v31 = vld [vmem:[#allocation7 + $0x8] sm:$0xff] }
  0x19   :  { %92 = vmatpush.msra.mxu0 %v77_v8  ;;  %v108_v32 = vld [vmem:[#allocation7] sm:$0xff]  ;;  %v193_v33 = vld [vmem:[%s357_s2] ss:$0 sm:$0xff]  ;;  %s306_s2 = smov [#allocation8]  }
  0x1a   :  { %133 = vmatpush.msra.mxu1 %v118_v13  ;;  %v194_v37 = vld [vmem:[%s359_s4] ss:$0 sm:$0xff]  ;;  %s173_s11 = sshll.u32 %s306_s2, 4  ;;  %s175_s4 = sshll.u32 %s360_s5, 4  ;;  %s174_s11 = int_to_ptr.vmem [resolvable:$true] %s173_s11  ;;  %s176_s4 = int_to_ptr.hbm [resolvable:$true] %s175_s4 }
  0x1b   :  { %93 = vmatpush.msra.mxu0 %v76_v10 }
  0x1c   :  { %134 = vmatpush.msra.mxu1 %v117_v15 }
  0x1d   :  { %94 = vmatpush.msra.mxu0 %v75_v12 }
  0x1e   :  { %135 = vmatpush.msra.mxu1 %v116_v17 }
  0x1f   :  { %95 = vmatpush.msra.mxu0 %v74_v14 }
  0x20   :  { %136 = vmatpush.msra.mxu1 %v115_v19 }
  0x21   :  { %96 = vmatpush.msra.mxu0 %v73_v16 }
  0x22   :  { %137 = vmatpush.msra.mxu1 %v114_v21 }
  0x23   :  { %97 = vmatpush.msra.mxu0 %v72_v18 }
  0x24   :  { %138 = vmatpush.msra.mxu1 %v113_v23 }
  0x25   :  { %98 = vmatpush.msra.mxu0 %v71_v20 }
  0x26   :  { %139 = vmatpush.msra.mxu1 %v112_v25 }
  0x27   :  { %99 = vmatpush.msra.mxu0 %v70_v22 }
  0x28   :  { %140 = vmatpush.msra.mxu1 %v111_v27 }
  0x29   :  { %100 = vmatpush.msra.mxu0 %v69_v24 }
  0x2a   :  { %141 = vmatpush.msra.mxu1 %v110_v30 }
  0x2b   :  { %101 = vmatpush.msra.mxu0 %v68_v26 }
  0x2c   :  { %142 = vmatpush.msra.mxu1 %v109_v31 }
  0x2d   :  { %102 = vmatpush.msra.mxu0 %v67_v28 }
  0x2e   :  { %103 = vmatmul.f32.vlgmr.msra.gmra.mxu0 %v66_v29  ;;  %143 = vmatpush.msra.mxu1 %v108_v32 }
  0xab   :  { %v104_v34 = vpop.f32.mrf.mxu0 }
  0xac   :  { %v105_v35 = vadd.f32 %v193_v33, %v104_v34 }
  0xae   :  { %v107_v36 = vmax.f32 %v105_v35, 0.0 }
  0xb0   :  { %144 = vmatmul.f32.vlgmr.msra.gmra.mxu1 %v107_v36 }
 0x12d   :  { %v145_v38 = vpop.f32.mrf.mxu1 }
 0x12e   :  { %v146_v39 = vadd.f32 %v194_v37, %v145_v38 }
 0x130   :  { %v186_v40 = vmul.f32 -1.442695, %v146_v39 }
 0x132   :  { %195 = vpow2.f32 %v186_v40 }
 0x138   :  { %v196_v41 = vpop.eup %195 }
 0x139   :  { %v151_v42 = vadd.f32 1.0, %v196_v41 }
 0x13b   :  { %197 = vrcp.f32 %v151_v42  ;;  %v163_v46 = vand.u32 2147483648, %v151_v42  ;;  %v161_v48 = vand.u32 2147483647, %v151_v42  ;;  %vm157_vm1 = vweird.f32 %v151_v42 }
 0x13d   :  { %v164_v50 = vor.u32 1.1754944e-38, %v163_v46  ;;  %vm162_vm3 = vcmp.eq.f32.partialorder %v161_v48, 8.507059e+37 }
 0x141   :  { %v198_v43 = vpop.eup %197 }
 0x142   :  { %v153_v44 = vmul.f32 %v198_v43, %v151_v42  ;;  %vm158_vm0 = vweird.f32 %v198_v43 }
 0x143   :  { %vm159_vm2 = vmor %vm157_vm1, %vm158_vm0 }
 0x144   :  { %v154_v45 = vsub.f32 1.0, %v153_v44 }
 0x146   :  { %v155_v47 = vmul.f32 %v198_v43, %v154_v45 }
 0x148   :  { %v156_v49 = vadd.f32 %v198_v43, %v155_v47 }
 0x14a   :  { %v160_v51 = vsel %vm159_vm2, %v198_v43, %v156_v49 }
 0x14b   :  { %v165_v52 = vsel %vm162_vm3, %v164_v50, %v160_v51 }
 0x14c   :  { %167 = vst [vmem:[#allocation8] sm:$0xff] %v165_v52 }
 0x14d   :  { %178 = dma.vmem_to_hbm [thread:$0]  %s174_s11, 128, %s176_s4, [#allocation4]  }
 0x14e   :  { %299 = dma.done.wait [#allocation4], 128  }
 0x14f   :  { %300 = vsyncadd [#allocation4], 4294967168 }
 0x150   :  { %183 = vsyncpa [#allocation3], 1 }
 0x151   :  { %184 = vsyncpa [#allocation6], 1 }
 0x152   :  { %185 = vsyncpa [#allocation4], 1 }

</bundles_post_ra>
